<compile_context>
chip_gen: v6e
topology: v6e:2x2x1
jax: 0.10.0
libtpu: 0.0.40
codegen_flags: <defaults>
</compile_context>

<pallas_src>
import functools

import jax
import jax.numpy as jnp
from jax import lax
from jax.experimental import pallas as pl
from jax.experimental.pallas import tpu as pltpu

LANES = 128


def _round_up(x, m):
    return (x + m - 1) // m * m


def _vmem_capacity_bytes():
    """Physical per-core VMEM; conservative 64 MiB (v7x) fallback if unknown."""
    try:
        info = pltpu.get_tpu_info()
        cap = getattr(info, "vmem_capacity_bytes", None)
        if cap:
            return int(cap)
    except Exception:
        pass
    return 64 * 1024 * 1024


_VMEM_CAP = _vmem_capacity_bytes()
# 128 MiB parts get ~100 MiB scoped VMEM, v7x (64 MiB) gets ~51 MiB.
VMEM_LIMIT = int(min(0.8 * _VMEM_CAP, 100 * 1024 * 1024))
# Per-grid-step working-set budget used by the row-tile chooser.
_TILE_BUDGET = int(max(8 * 1024 * 1024, min(0.35 * _VMEM_CAP, 40 * 1024 * 1024)))


def _choose_row_tile(H, W, cin, cout, itemsize, *, cres=0, upsample=False, budget=None):
    """Largest row tile TH (divisor of H, capped at 64) whose per-step working set fits
    the budget.  Counts: activated flat slab, f32 accumulator(s), double-buffered
    input/output/residual blocks + halo rows, tap weights, and the 2x-wider output for
    the upsample path."""
    if budget is None:
        budget = _TILE_BUDGET
    S = W + 2
    up = 2 if upsample else 1
    divisors = [d for d in range(1, min(H, 64) + 1) if H % d == 0]
    cand = [d for d in divisors if d % 8 == 0] or divisors
    best = cand[0]
    for th in sorted(cand):
        need = (
            ((th + 2) * S + 8) * cin * itemsize              # activated slab scratch
            + 2 * (th + 2) * W * cin * itemsize              # dbl-buffered body + halos
            + 2 * (up * th) * (up * W) * cout * itemsize     # dbl-buffered output block
            + 2 * th * W * cres * itemsize                   # dbl-buffered residual
            + 2 * (16 if upsample else 9) * cin * cout * itemsize  # tap weights
            + (2 if upsample else 1) * th * S * cout * 4     # live f32 accumulator(s)
            + up * up * th * W * cout * 4                    # f32 epilogue temporaries
        )
        if need <= budget:
            best = th
    return best


# ----------------------------------------------------------------------------
# Standalone per-channel moments (only for the block's very first input)
# ----------------------------------------------------------------------------
def _stats_kernel(x_ref, st_ref):
    x = x_ref[0].astype(jnp.float32)                      # (TH, W, C)
    xf = x.reshape(-1, x.shape[-1])
    s1 = jnp.sum(xf, axis=0, keepdims=True)
    s2 = jnp.sum(xf * xf, axis=0, keepdims=True)
    st_ref[0, 0] = jnp.concatenate([s1, s2], axis=0)


def channel_moments(x):
    N, H, W, C = x.shape
    itemsize = jnp.dtype(x.dtype).itemsize
    TH = _choose_row_tile(H, W, C, C, itemsize)
    RT = H // TH
    return pl.pallas_call(
        _stats_kernel,
        out_shape=jax.ShapeDtypeStruct((N, RT, 2, C), jnp.float32),
        grid=(N, RT),
        in_specs=[pl.BlockSpec((1, TH, W, C), lambda n, r: (n, r, 0, 0))],
        out_specs=pl.BlockSpec((1, 1, 2, C), lambda n, r: (n, r, 0, 0)),
        compiler_params=pltpu.CompilerParams(
            dimension_semantics=("parallel", "parallel"),
            vmem_limit_bytes=VMEM_LIMIT),
    )(x)


def gn_fold(stats, gamma, beta, *, groups, c_orig, hw, eps):
    """Per-(N, C) GroupNorm scale/shift with the affine folded in:
    y = x*scale + shift == (x - mean_g) * rsqrt(var_g + eps) * gamma + beta.
    `stats` are per-row-tile (sum, sum_sq) partials of shape (N, RT, 2, C).
    TODO(synk): at very large spatial sizes the E[x^2]-E[x]^2 form loses f32 precision;
    a compensated / mean-subtracted accumulation would be more robust."""
    s = stats.sum(axis=1)                                  # (N, 2, C)
    N, _, C = s.shape
    gs = c_orig // groups
    n_elems = float(hw * gs)
    s1 = s[:, 0, :c_orig].reshape(N, groups, gs).sum(-1)
    s2 = s[:, 1, :c_orig].reshape(N, groups, gs).sum(-1)
    mean = s1 / n_elems
    var = jnp.maximum(s2 / n_elems - mean * mean, 0.0)     # cancellation guard
    rstd = lax.rsqrt(var + eps)
    mean_c = jnp.repeat(mean, gs, axis=-1)                 # (N, c_orig)
    rstd_c = jnp.repeat(rstd, gs, axis=-1)
    scale = rstd_c * gamma[:c_orig][None, :]
    shift = beta[:c_orig][None, :] - mean_c * scale
    ss = jnp.stack([scale, shift], axis=1)                 # (N, 2, c_orig)
    return jnp.pad(ss, ((0, 0), (0, 0), (0, C - c_orig))).astype(jnp.float32)


# ----------------------------------------------------------------------------
# Fused (GroupNorm + SiLU) -> 3x3 conv [-> 1x1 shortcut + residual + scale]
#   [-> moments of the output], row-tiled with a 1-row halo.
# ----------------------------------------------------------------------------
def _fused_conv_kernel(*refs, W, TH, cdt, inv_scale, has_res, has_shortcut, with_stats):
    it = iter(refs)
    x_ref = next(it)                                      # (1, TH, W, Cin)
    top_ref = next(it)                                    # (1, 1, W, Cin)
    bot_ref = next(it)                                    # (1, 1, W, Cin)
    ss_ref = next(it)                                     # (1, 2, Cin)  f32
    w_ref = next(it)                                      # (9, Cin, Cout)
    b_ref = next(it)                                      # (1, Cout)
    res_ref = next(it) if has_res else None               # (1, TH, W, Cres)
    scw_ref = next(it) if has_shortcut else None          # (Cres, Cout)
    scb_ref = next(it) if has_shortcut else None          # (1, Cout)
    o_ref = next(it)                                      # (1, TH, W, Cout)
    st_ref = next(it) if with_stats else None             # (1, 1, 2, Cout)
    slab_ref = next(it)                                   # ((TH+2)*S + 8, Cin)

    r = pl.program_id(1)
    nr = pl.num_programs(1)
    S = W + 2
    cin = x_ref.shape[-1]
    cout = w_ref.shape[-1]

    # Fused normalize (scale/shift) + SiLU, applied row-by-row while staging the
    # zero-padded flat conv slab.
    ss = ss_ref[0].astype(jnp.float32)                    # (2, Cin)
    scale = jnp.broadcast_to(ss[0:1, :], (W, cin))        # hoisted broadcasts
    shift = jnp.broadcast_to(ss[1:2, :], (W, cin))

    def prep(rows):                                       # (W, Cin) -> activated cdt
        y = rows.astype(jnp.float32) * scale + shift
        return (y * jax.nn.sigmoid(y)).astype(cdt)

    zpad = jnp.zeros((1, cin), cdt)

    def put_row(slab_row, data2d):                        # data2d: (W, Cin) in cdt
        slab_ref[pl.ds(slab_row * S, S), :] = jnp.concatenate(
            [zpad, data2d, zpad], axis=0)

    zrow = jnp.zeros((W, cin), cdt)
    put_row(0, jnp.where(r > 0, prep(top_ref[0, 0]), zrow))
    put_row(TH + 1, jnp.where(r < nr - 1, prep(bot_ref[0, 0]), zrow))
    slab_ref[pl.ds((TH + 2) * S, 8), :] = jnp.zeros((8, cin), cdt)  # slack (hygiene)
    for i in range(TH):
        put_row(i + 1, prep(x_ref[0, i]))

    # 3x3 conv: 9 contiguous-slice MXU matmuls on the flat slab.
    M = TH * S
    acc = jnp.zeros((M, cout), jnp.float32)
    for dy in range(3):
        for dx in range(3):
            xs = slab_ref[pl.ds(dy * S + dx, M), :]
            acc = acc + jnp.dot(xs, w_ref[dy * 3 + dx],
                                preferred_element_type=jnp.float32)
    acc = acc + b_ref[...].astype(jnp.float32)
    out = acc.reshape(TH, S, cout)[:, :W, :]              # drop the 2 junk pad columns

    if has_shortcut:                                      # fused 1x1 shortcut conv
        resf = res_ref[0].astype(cdt).reshape(TH * W, -1)
        sc = jnp.dot(resf, scw_ref[...], preferred_element_type=jnp.float32)
        sc = sc + scb_ref[...].astype(jnp.float32)
        out = (out + sc.reshape(TH, W, cout)) * inv_scale
    elif has_res:
        out = (out + res_ref[0].astype(jnp.float32)) * inv_scale

    o_ref[0] = out.astype(o_ref.dtype)

    if with_stats:                                        # moments for the next norm
        of = out.reshape(TH * W, cout)
        s1 = jnp.sum(of, axis=0, keepdims=True)
        s2 = jnp.sum(of * of, axis=0, keepdims=True)
        st_ref[0, 0] = jnp.concatenate([s1, s2], axis=0)


def conv3x3_fused(x, ss, w9, b, *, res=None, shortcut_w=None, shortcut_b=None,
                  output_scale_factor=1.0, with_stats=False):
    N, H, W, Cin = x.shape
    Cout = w9.shape[-1]
    cdt = x.dtype
    itemsize = jnp.dtype(cdt).itemsize
    has_res = res is not None
    has_sc = shortcut_w is not None
    cres = res.shape[-1] if has_res else 0
    TH = _choose_row_tile(H, W, Cin, Cout, itemsize, cres=cres)
    RT = H // TH
    S = W + 2

    kernel = functools.partial(
        _fused_conv_kernel, W=W, TH=TH, cdt=cdt,
        inv_scale=1.0 / float(output_scale_factor),
        has_res=has_res, has_shortcut=has_sc, with_stats=with_stats)

    body_idx = lambda n, r: (n, r, 0, 0)
    top_idx = lambda n, r: (n, jnp.maximum(r * TH - 1, 0), 0, 0)
    bot_idx = lambda n, r: (n, jnp.minimum(r * TH + TH, H - 1), 0, 0)

    in_specs = [
        pl.BlockSpec((1, TH, W, Cin), body_idx),          # body rows (auto-pipelined)
        pl.BlockSpec((1, 1, W, Cin), top_idx),            # top halo row
        pl.BlockSpec((1, 1, W, Cin), bot_idx),            # bottom halo row
        pl.BlockSpec((1, 2, Cin), lambda n, r: (n, 0, 0)),
        pl.BlockSpec((9, Cin, Cout), lambda n, r: (0, 0, 0)),
        pl.BlockSpec((1, Cout), lambda n, r: (0, 0)),
    ]
    args = [x, x, x, ss, w9.astype(cdt), b.reshape(1, Cout)]
    if has_res:
        in_specs.append(pl.BlockSpec((1, TH, W, cres), body_idx))
        args.append(res)
    if has_sc:
        in_specs += [pl.BlockSpec((cres, Cout), lambda n, r: (0, 0)),
                     pl.BlockSpec((1, Cout), lambda n, r: (0, 0))]
        args += [shortcut_w.astype(cdt), shortcut_b.reshape(1, Cout)]

    if with_stats:
        out_shape = (jax.ShapeDtypeStruct((N, H, W, Cout), cdt),
                     jax.ShapeDtypeStruct((N, RT, 2, Cout), jnp.float32))
        out_specs = (pl.BlockSpec((1, TH, W, Cout), body_idx),
                     pl.BlockSpec((1, 1, 2, Cout), body_idx))
    else:
        out_shape = jax.ShapeDtypeStruct((N, H, W, Cout), cdt)
        out_specs = pl.BlockSpec((1, TH, W, Cout), body_idx)

    return pl.pallas_call(
        kernel,
        out_shape=out_shape,
        grid=(N, RT),
        in_specs=in_specs,
        out_specs=out_specs,
        scratch_shapes=[pltpu.VMEM(((TH + 2) * S + 8, Cin), cdt)],
        compiler_params=pltpu.CompilerParams(
            dimension_semantics=("parallel", "parallel"),
            vmem_limit_bytes=VMEM_LIMIT),
    )(*args)


# ----------------------------------------------------------------------------
# Subpixel (4-phase) nearest-2x upsample + 3x3 conv: pixel duplication folded into
# the weights; each phase is a 2x2-tap conv at source resolution.
# ----------------------------------------------------------------------------
def _fold_upsample_weights(w9):
    """(9, Cin, Cout) taps (t = dy*3+dx) -> (16, Cin, Cout) folded phase taps
    indexed ((pi*2+pj)*4 + a*2 + b)."""
    grp = {0: ((0,), (1, 2)), 1: ((0, 1), (2,))}
    taps = []
    for pi in range(2):
        for pj in range(2):
            for a in range(2):
                for b in range(2):
                    acc = None
                    for dy in grp[pi][a]:
                        for dx in grp[pj][b]:
                            t = w9[dy * 3 + dx]
                            acc = t if acc is None else acc + t
                    taps.append(acc)
    return jnp.stack(taps, axis=0)


def _upsample_conv_kernel(x_ref, top_ref, bot_ref, wf_ref, b_ref, o_ref, slab_ref,
                          *, W, TH, cdt):
    r = pl.program_id(1)
    nr = pl.num_programs(1)
    S = W + 2
    cin = x_ref.shape[-1]
    cout = wf_ref.shape[-1]

    zpad = jnp.zeros((1, cin), cdt)

    def put_row(slab_row, data2d):
        slab_ref[pl.ds(slab_row * S, S), :] = jnp.concatenate(
            [zpad, data2d.astype(cdt), zpad], axis=0)

    zrow = jnp.zeros((W, cin), cdt)
    put_row(0, jnp.where(r > 0, top_ref[0, 0].astype(cdt), zrow))
    put_row(TH + 1, jnp.where(r < nr - 1, bot_ref[0, 0].astype(cdt), zrow))
    slab_ref[pl.ds((TH + 2) * S, 8), :] = jnp.zeros((8, cin), cdt)
    for i in range(TH):
        put_row(i + 1, x_ref[0, i])

    bias = b_ref[...].astype(jnp.float32)                 # (1, Cout)
    M = TH * S

    def phase(pi, pj):                                    # one 2x2-tap conv
        acc = jnp.zeros((M, cout), jnp.float32)
        for a in range(2):
            for b2 in range(2):
                xs = slab_ref[pl.ds((pi + a) * S + (pj + b2), M), :]
                acc = acc + jnp.dot(xs, wf_ref[(pi * 2 + pj) * 4 + a * 2 + b2],
                                    preferred_element_type=jnp.float32)
        acc = acc + bias
        return acc.reshape(TH, S, cout)[:, :W, :].astype(o_ref.dtype)

    p00, p01 = phase(0, 0), phase(0, 1)
    row0 = jnp.stack([p00, p01], axis=2).reshape(TH, 2 * W, cout)   # col interleave
    p10, p11 = phase(1, 0), phase(1, 1)
    row1 = jnp.stack([p10, p11], axis=2).reshape(TH, 2 * W, cout)
    o_ref[0] = jnp.stack([row0, row1], axis=1).reshape(2 * TH, 2 * W, cout)


def upsample2x_conv3x3(x, w9, b):
    N, H, W, Cin = x.shape
    Cout = w9.shape[-1]
    cdt = x.dtype
    itemsize = jnp.dtype(cdt).itemsize
    TH = _choose_row_tile(H, W, Cin, Cout, itemsize, upsample=True)
    RT = H // TH
    S = W + 2
    wf = _fold_upsample_weights(w9).astype(cdt)
    kernel = functools.partial(_upsample_conv_kernel, W=W, TH=TH, cdt=cdt)
    body_idx = lambda n, r: (n, r, 0, 0)
    return pl.pallas_call(
        kernel,
        out_shape=jax.ShapeDtypeStruct((N, 2 * H, 2 * W, Cout), cdt),
        grid=(N, RT),
        in_specs=[
            pl.BlockSpec((1, TH, W, Cin), body_idx),
            pl.BlockSpec((1, 1, W, Cin),
                         lambda n, r: (n, jnp.maximum(r * TH - 1, 0), 0, 0)),
            pl.BlockSpec((1, 1, W, Cin),
                         lambda n, r: (n, jnp.minimum(r * TH + TH, H - 1), 0, 0)),
            pl.BlockSpec((16, Cin, Cout), lambda n, r: (0, 0, 0)),
            pl.BlockSpec((1, Cout), lambda n, r: (0, 0)),
        ],
        out_specs=pl.BlockSpec((1, 2 * TH, 2 * W, Cout), body_idx),
        scratch_shapes=[pltpu.VMEM(((TH + 2) * S + 8, Cin), cdt)],
        compiler_params=pltpu.CompilerParams(
            dimension_semantics=("parallel", "parallel"),
            vmem_limit_bytes=VMEM_LIMIT),
    )(x, x, x, wf, b.reshape(1, Cout))


# ----------------------------------------------------------------------------
# Module forward (UpDecoderBlock2D semantics)
# ----------------------------------------------------------------------------
def resnet_block(x, p, x_stats, *, groups, eps, output_scale_factor, need_out_stats):
    N, H, W, _ = x.shape
    ss1 = gn_fold(x_stats, p["norm1_g"], p["norm1_b"], groups=groups,
                  c_orig=p["c_in"], hw=H * W, eps=eps)
    h, h_stats = conv3x3_fused(x, ss1, p["conv1_w"], p["conv1_b"], with_stats=True)
    ss2 = gn_fold(h_stats, p["norm2_g"], p["norm2_b"], groups=groups,
                  c_orig=p["c_out"], hw=H * W, eps=eps)
    # dropout(p=0.0) is the identity
    return conv3x3_fused(h, ss2, p["conv2_w"], p["conv2_b"], res=x,
                         shortcut_w=p.get("shortcut_w"),
                         shortcut_b=p.get("shortcut_b"),
                         output_scale_factor=output_scale_factor,
                         with_stats=need_out_stats)


def up_decoder_block_2d(x, params, *, groups, eps, output_scale_factor):
    resnets = params["resnets"]
    stats = channel_moments(x)                 # only the block's first input needs this
    for i, rp in enumerate(resnets):
        need = i < len(resnets) - 1            # next resnet's norm1 stats, fused
        r = resnet_block(x, rp, stats, groups=groups, eps=eps,
                         output_scale_factor=output_scale_factor,
                         need_out_stats=need)
        if need:
            x, stats = r
        else:
            x = r
    if params.get("upsample") is not None:
        x = upsample2x_conv3x3(x, params["upsample"]["w"], params["upsample"]["b"])
    return x


# ----------------------------------------------------------------------------
# Deterministic parameter init (PyTorch-style) + packing to kernel layout
# ----------------------------------------------------------------------------
def _conv_init(key, cout, cin, k):
    wkey, bkey = jax.random.split(key)
    bound = 1.0 / (cin * k * k) ** 0.5
    w = jax.random.uniform(wkey, (cout, cin, k, k), jnp.float32, -bound, bound)
    b = jax.random.uniform(bkey, (cout,), jnp.float32, -bound, bound)
    return w, b


def init_raw_params(key, in_channels, out_channels, num_layers, add_upsample):
    keys = jax.random.split(key, num_layers * 3 + 1)
    resnets = []
    for i in range(num_layers):
        cin = in_channels if i == 0 else out_channels
        w1, b1 = _conv_init(keys[3 * i], out_channels, cin, 3)
        w2, b2 = _conv_init(keys[3 * i + 1], out_channels, out_channels, 3)
        p = {
            "c_in": cin, "c_out": out_channels,
            "norm1_g": jnp.ones((cin,), jnp.float32),
            "norm1_b": jnp.zeros((cin,), jnp.float32),
            "conv1_w": w1, "conv1_b": b1,
            "norm2_g": jnp.ones((out_channels,), jnp.float32),
            "norm2_b": jnp.zeros((out_channels,), jnp.float32),
            "conv2_w": w2, "conv2_b": b2,
        }
        if cin != out_channels:
            ws, bs = _conv_init(keys[3 * i + 2], out_channels, cin, 1)
            p["shortcut_w"] = ws
            p["shortcut_b"] = bs
        resnets.append(p)
    params = {"resnets": resnets, "upsample": None}
    if add_upsample:
        wu, bu = _conv_init(keys[-1], out_channels, out_channels, 3)
        params["upsample"] = {"w": wu, "b": bu}
    return params


def _to_taps(w, cin_p, cout_p):   # (Cout,Cin,3,3) -> (9, Cin_p, Cout_p), tap = dy*3+dx
    cout, cin = w.shape[0], w.shape[1]
    t = jnp.transpose(w, (2, 3, 1, 0)).reshape(9, cin, cout)
    return jnp.pad(t, ((0, 0), (0, cin_p - cin), (0, cout_p - cout)))


def _pad1(v, cp):
    return jnp.pad(v, (0, cp - v.shape[0]))


def pack_params(raw, in_channels, out_channels):
    """Kernel layout + zero-pad channels to multiples of 128 (padded channels have
    gamma=beta=bias=weights=0, so they stay exactly zero)."""
    cp_in = _round_up(in_channels, LANES)
    cp_out = _round_up(out_channels, LANES)
    resnets = []
    for i, rp in enumerate(raw["resnets"]):
        cin = rp["c_in"]
        cp_i = cp_in if i == 0 else cp_out
        p = {
            "c_in": cin, "c_out": rp["c_out"],
            "norm1_g": _pad1(rp["norm1_g"], cp_i),
            "norm1_b": _pad1(rp["norm1_b"], cp_i),
            "conv1_w": _to_taps(rp["conv1_w"], cp_i, cp_out),
            "conv1_b": _pad1(rp["conv1_b"], cp_out),
            "norm2_g": _pad1(rp["norm2_g"], cp_out),
            "norm2_b": _pad1(rp["norm2_b"], cp_out),
            "conv2_w": _to_taps(rp["conv2_w"], cp_out, cp_out),
            "conv2_b": _pad1(rp["conv2_b"], cp_out),
        }
        if "shortcut_w" in rp:
            sw = rp["shortcut_w"][:, :, 0, 0].T                       # (Cin, Cout)
            p["shortcut_w"] = jnp.pad(sw, ((0, cp_i - cin), (0, cp_out - rp["c_out"])))
            p["shortcut_b"] = _pad1(rp["shortcut_b"], cp_out)
        resnets.append(p)
    packed = {"resnets": resnets, "upsample": None}
    if raw["upsample"] is not None:
        packed["upsample"] = {"w": _to_taps(raw["upsample"]["w"], cp_out, cp_out),
                              "b": _pad1(raw["upsample"]["b"], cp_out)}
    return packed


# ----------------------------------------------------------------------------
# Pure-JAX reference (for the numerical check)
# ----------------------------------------------------------------------------
def _ref_gn_silu(x, gamma, beta, groups, eps):
    N, H, W, C = x.shape
    xg = x.reshape(N, H, W, groups, C // groups)
    mean = xg.mean(axis=(1, 2, 4), keepdims=True)
    var = jnp.mean((xg - mean) ** 2, axis=(1, 2, 4), keepdims=True)
    y = ((xg - mean) / jnp.sqrt(var + eps)).reshape(N, H, W, C)
    y = y * gamma + beta
    return y * jax.nn.sigmoid(y)


def _ref_conv3x3(x, w, b):
    return lax.conv_general_dilated(
        x, w, window_strides=(1, 1), padding=((1, 1), (1, 1)),
        dimension_numbers=("NHWC", "OIHW", "NHWC")) + b


def _ref_up_decoder_block(x, raw, groups, eps, osf):
    for rp in raw["resnets"]:
        h = _ref_gn_silu(x, rp["norm1_g"], rp["norm1_b"], groups, eps)
        h = _ref_conv3x3(h, rp["conv1_w"], rp["conv1_b"])
        h = _ref_gn_silu(h, rp["norm2_g"], rp["norm2_b"], groups, eps)
        h = _ref_conv3x3(h, rp["conv2_w"], rp["conv2_b"])
        if "shortcut_w" in rp:
            sc = jnp.einsum("nhwc,oc->nhwo", x, rp["shortcut_w"][:, :, 0, 0]) + rp["shortcut_b"]
        else:
            sc = x
        x = (sc + h) / osf
    if raw["upsample"] is not None:
        x = jnp.repeat(jnp.repeat(x, 2, axis=1), 2, axis=2)
        x = _ref_conv3x3(x, raw["upsample"]["w"], raw["upsample"]["b"])
    return x


# ----------------------------------------------------------------------------
if __name__ == "__main__":
    key = jax.random.PRNGKey(0)
    kparam, kx = jax.random.split(key)

    # Small shapes consistent with the module (resnet_groups must divide channels)
    N, in_channels, out_channels, H, W = 2, 8, 16, 16, 16
    groups, eps, output_scale_factor = 4, 1e-6, 1.0
    num_layers, add_upsample = 2, True

    raw = init_raw_params(kparam, in_channels, out_channels, num_layers, add_upsample)
    params = pack_params(raw, in_channels, out_channels)

    # PyTorch-convention NCHW input -> NHWC (+ lane padding) for the kernels
    x_nchw = jax.random.normal(kx, (N, in_channels, H, W), jnp.float32)
    x = jnp.transpose(x_nchw, (0, 2, 3, 1))
    cp_in = _round_up(in_channels, LANES)
    x_pad = jnp.pad(x, ((0, 0), (0, 0), (0, 0), (0, cp_in - in_channels)))

    y_pad = up_decoder_block_2d(x_pad, params, groups=groups, eps=eps,
                                output_scale_factor=output_scale_factor)
    y = y_pad[..., :out_channels]
    y_nchw = jnp.transpose(y, (0, 3, 1, 2))
    jax.block_until_ready(y_nchw)

    assert y_nchw.shape == (N, out_channels, 2 * H, 2 * W), y_nchw.shape
    assert bool(jnp.all(jnp.isfinite(y_nchw)))

    # Numerical check against a pure-JAX reference of the module (f32 path)
    y_ref = _ref_up_decoder_block(x, raw, groups, eps, output_scale_factor)
    y_ref_nchw = jnp.transpose(y_ref, (0, 3, 1, 2))
    err = float(jnp.max(jnp.abs(y_nchw - y_ref_nchw)))
    assert err < 5e-3, f"max abs err {err}"

    # bf16 end-to-end smoke run (weights cast inside the wrappers, f32 accumulation)
    y_bf = up_decoder_block_2d(x_pad.astype(jnp.bfloat16), params, groups=groups,
                               eps=eps, output_scale_factor=output_scale_factor)
    jax.block_until_ready(y_bf)
    assert y_bf.dtype == jnp.bfloat16
    assert bool(jnp.all(jnp.isfinite(y_bf.astype(jnp.float32))))

    print("KERNEL_OK")
</pallas_src>

<mosaic_0001>
module attributes {stable_mosaic.version = 11 : i64} {
  func.func @_stats_kernel(%arg0: i32, %arg1: i32, %arg2: memref<1x16x16x128xf32, #tpu.memory_space<vmem>>, %arg3: memref<1x1x2x128xf32, #tpu.memory_space<vmem>>) attributes {dimension_semantics = [#tpu.dimension_semantics<parallel>, #tpu.dimension_semantics<parallel>], iteration_bounds = array<i64: 2, 1>, scalar_prefetch = 0 : i64, scratch_operands = 0 : i64, tpu.core_type = #tpu.core_type<tc>, window_params = [{transform_indices = @transform_0, window_bounds = array<i64: 1, 16, 16, 128>}, {transform_indices = @transform_1, window_bounds = array<i64: 1, 1, 2, 128>}]} {
    %c0 = arith.constant 0 : index
    %c0_0 = arith.constant 0 : index
    %c0_1 = arith.constant 0 : index
    %c0_2 = arith.constant 0 : index
    %0 = vector.load %arg2[%c0, %c0_0, %c0_1, %c0_2] : memref<1x16x16x128xf32, #tpu.memory_space<vmem>>, vector<1x16x16x128xf32>
    %1 = vector.shape_cast %0 : vector<1x16x16x128xf32> to vector<16x16x128xf32>
    %2 = vector.shape_cast %1 : vector<16x16x128xf32> to vector<256x128xf32>
    %cst = arith.constant dense<0.000000e+00> : vector<128xf32>
    %3 = vector.multi_reduction <add>, %2, %cst [0] : vector<256x128xf32> to vector<128xf32>
    %4 = vector.shape_cast %3 : vector<128xf32> to vector<1x128xf32>
    %5 = arith.mulf %2, %2 : vector<256x128xf32>
    %cst_3 = arith.constant dense<0.000000e+00> : vector<128xf32>
    %6 = vector.multi_reduction <add>, %5, %cst_3 [0] : vector<256x128xf32> to vector<128xf32>
    %7 = vector.shape_cast %6 : vector<128xf32> to vector<1x128xf32>
    %8 = tpu.concatenate %4, %7 in 0 : vector<1x128xf32>, vector<1x128xf32> -> vector<2x128xf32>
    %c0_4 = arith.constant 0 : index
    %c0_5 = arith.constant 0 : index
    %c0_6 = arith.constant 0 : index
    %c0_7 = arith.constant 0 : index
    %9 = vector.load %arg3[%c0_4, %c0_5, %c0_6, %c0_7] : memref<1x1x2x128xf32, #tpu.memory_space<vmem>>, vector<1x1x2x128xf32>
    %10 = vector.shape_cast %9 : vector<1x1x2x128xf32> to vector<2x128xf32>
    %11 = vector.shape_cast %8 : vector<2x128xf32> to vector<1x1x2x128xf32>
    tpu.vector_store %arg3[%c0_4, %c0_5, %c0_6, %c0_7], %11 {strides = array<i32>} : memref<1x1x2x128xf32, #tpu.memory_space<vmem>>, vector<1x1x2x128xf32>,
    return
  }
  func.func @transform_0(%arg0: i32, %arg1: i32) -> (i32, i32, i32, i32) {
    %c0_i32 = arith.constant 0 : i32
    %c0_i32_0 = arith.constant 0 : i32
    %c0_i32_1 = arith.constant 0 : i32
    return %arg0, %arg1, %c0_i32, %c0_i32_0 : i32, i32, i32, i32
  }
  func.func @transform_1(%arg0: i32, %arg1: i32) -> (i32, i32, i32, i32) {
    %c0_i32 = arith.constant 0 : i32
    %c0_i32_0 = arith.constant 0 : i32
    %c0_i32_1 = arith.constant 0 : i32
    return %arg0, %arg1, %c0_i32, %c0_i32_0 : i32, i32, i32, i32
  }
}

</mosaic_0001>

<bundles_post_ra>
// kernel: tpu_custom_call.1
= control target key start
LH: loop header
LB: loop body
LE: loop exit
PB: predicated region body
PF: predicated region fallthrough
CT: control target
= control target key end

     0   :  { %6 = vsyncpa [#allocation3], 0  ;;  %s769_s0 = inlined_call_operand.hbm [shape: f32[2,16,16,128], index: 0, kind: input, shape index: {}]   ;;  %s770_s1 = inlined_call_operand.hbm [shape: f32[2,1,2,128], index: 1, kind: output, shape index: {}]  }
   0x1   :  { %8 = vsyncpa [#allocation3 + $0x1], 0 }
   0x2   :  { %9 = vsyncpa [#allocation4], 0 }
   0x3   :  { %11 = vsyncpa [#allocation4 + $0x1], 0  ;;  %s596_s6 = smov 0   ;;  %s598_s7 = smov 0  }
   0x4   :  { %s600_s8 = smov 0   ;;  %s602_s9 = smov 0  }
   0x5   :  { %s604_s10 = smov 0   ;;  %s606_s11 = smov 0  }
   0x6 LB: > { %s393_s12 = sadd.s32 4294967295, %s580_s11   ;;  %s394_s13 = sadd.s32 4294967294, %s580_s11   ;;  %s580_s11 = sphi %s606_s11, %s17_s11   ;;  %s576_s10 = sphi %s604_s10, %s781_s10   ;;  %s572_s9 = sphi %s602_s9, %s780_s9   ;;  %s568_s8 = sphi %s600_s8, %s779_s8   ;;  %s564_s7 = sphi %s598_s7, %s778_s7   ;;  %s560_s6 = sphi %s596_s6, %s777_s6  }
   0x7   : > { %s29_s14 = sadd.s32 1, %s576_s10  ;;  %s38_s15 = sadd.s32 1, %s568_s8 }
   0x8   : > { %p31_p0 = scmp.ge.s32.totalorder %s29_s14, 2  ;;  %p45_p1 = scmp.ne.s32.totalorder %s568_s8, %s564_s7 }
   0x9   : > { %p46_p2 = scmp.eq.s32.totalorder %s580_s11, 0  ;;  %p51_p3 = scmp.ne.s32.totalorder %s564_s7, %s560_s6 }
   0xa   : > { %s783_s14 = smov (%p31_p0, %s29_s14), 0  ;;  %p52_p5 = scmp.eq.s32.totalorder %s393_s12, 0 }
   0xb   : > { %p637_p4 = por %p46_p2, %p45_p1  ;;  %s33_s17 = ssub.s32 %s576_s10, %s783_s14 }
   0xc   : > { %p77_p6 = scmp.eq.s32.totalorder %s393_s12, 1  ;;  %p36_p7 = scmp.eq.s32.totalorder %s33_s17, 0 }
   0xd   : > { %p643_p8 = por %p52_p5, %p51_p3  ;;  %p83_p10 = scmp.eq.s32.totalorder %s394_s13, 1 }
   0xe   : > { %p647_p9 = por %p77_p6, %p45_p1  ;;  %p420_p13 = scmp.lt.s32.totalorder %s580_s11, 2 }
   0xf   : > { %s652_s20 = scalar_select %p36_p7, %s568_s8, %s38_s15  }
  0x10   : > { %p654_p11 = por %p83_p10, %p51_p3  ;;  %s103_s22 = sand.u32 1, %s568_s8  }
  0x11   : > { %s397_s23 = sshll.u32 %s103_s22, 8  ;;  %s407_s24 = sshll.u32 %s576_s10, 12 }
  0x12   : > { %s116_s27 = scalar_lea.hbm %s769_s0, %s407_s24  ;;  %s107_s28 = scalar_lea.vmem [#allocation2], %s397_s23 }
  0x13   : > { %s117_s29 = sshll.u32 %s107_s28, 4  ;;  %p667_p0 = pnand %p420_p13, %p637_p4  ;;  %s118_s29 = int_to_ptr.vmem [resolvable:$true] %s117_s29 }
  0x14   : > { %p400_p1 = scmp.ge.s32.totalorder %s580_s11, 1  ;;  %s104_s2 = scalar_lea.sflag [#allocation3], %s103_s22 }
  0x15   : > { %p474_p2 = pneg %p667_p0  ;;  %s485_s3 = scalar_lea.vmem %s118_s29, 4096 }
  0x16   : > { %p486_p3 = scmp.ne.s32.totalorder %s118_s29, %s485_s3  ;;  %s582_s4 = smov [#allocation2]  }
  0x17   : > { %s490_s5 = sshll.u32 %s582_s4, 4  ;;  %s491_s5 = int_to_ptr.vmem [resolvable:$false] %s490_s5 }
  0x18   : > { %p488_p5 = pnand %p486_p3, %p474_p2  ;;  %s492_s12 = scalar_lea.vmem %s491_s5, 8192 }
  0x19   : > { %p493_p7 = scmp.lt.s32.totalorder %s118_s29, %s491_s5  ;;  %p494_p10 = scmp.lt.s32.totalorder %s492_s12, %s485_s3 }
  0x1a   : > { %p489_p6 = pneg %p488_p5 }
  0x1b   : > { %p495_p12 = por %p494_p10, %p493_p7 }
  0x1d   : > { %p496_p4 = pnand %p495_p12, %p489_p6 }
  0x1f   : > { %499 = shalt.err (!%p496_p4)
}
  0x20   : > { %s583_s13 = smov 128   ;;  %s584_s15 = smov 8  }
  0x21   : > { %415 = dma.hbm_to_vmem [thread:$0]  (!%p667_p0), %s116_s27, 4096, %s118_s29, %s104_s2, %s583_s13, %s583_s13, %s584_s15  }
  0x22   : > { %p125_p13 = scmp.lt.s32.totalorder %s580_s11, 3 }
  0x24   : > { %p126_p2 = pnand %p400_p1, %p125_p13 }
  0x25   : > { %s680_s16 = sand.u32 (!%p126_p2), 1, %s564_s7  }
  0x26   : > { %129 = sbr.rel (%p126_p2) target bundleno = 135 (0x87), region = 24  ;;  %s401_s17 = sshll.u32 (!%p126_p2), %s680_s16, 8 }
  0x27   : > { %s132_s22 = scalar_lea.sflag (!%p126_p2), [#allocation3], %s680_s16  ;;  %s684_s23 = scalar_lea.vmem (!%p126_p2), [#allocation2], %s401_s17 }
  0x2b   : > { %551 = dma.done.wait (%p643_p8), %s132_s22, 4096  }
  0x2c   : > { %553 = vsyncadd (%p643_p8), %s132_s22, 4294963200  ;;  %v155_v0 = vld [vmem:[%s684_s23] sm:$0xff]  ;;  %v156_v1 = vld [vmem:[%s684_s23 + $0x8] sm:$0xff]  ;;  %s402_s18 = sshll.u32 %s680_s16, 1  ;;  %s404_s26 = sshll.u32 %s572_s9, 5  ;;  %vm293_vm0 = vcmask 1040384  }
  0x2d   : > { %v157_v2 = vld [vmem:[%s684_s23 + $0x10] sm:$0xff]  ;;  %v158_v3 = vld [vmem:[%s684_s23 + $0x18] sm:$0xff]  ;;  %v187_v4 = vadd.f32 %v156_v1, %v155_v0  ;;  %v224_v5 = vmul.f32 %v155_v0, %v155_v0  ;;  %v225_v6 = vmul.f32 %v156_v1, %v156_v1  ;;  %v159_v8 = vld [vmem:[%s684_s23 + $0x20] sm:$0xff]  ;;  %s153_s24 = scalar_lea.vmem [#allocation5], %s402_s18  ;;  %s309_s29 = scalar_lea.hbm %s770_s1, %s404_s26 }
  0x2e   : > { %v226_v7 = vmul.f32 %v157_v2, %v157_v2  ;;  %v227_v10 = vmul.f32 %v158_v3, %v158_v3  ;;  %v160_v12 = vld [vmem:[%s684_s23 + $0x28] sm:$0xff]  ;;  %v228_v14 = vmul.f32 %v159_v8, %v159_v8  ;;  %v161_v16 = vld [vmem:[%s684_s23 + $0x30] sm:$0xff]  ;;  %v162_v20 = vld [vmem:[%s684_s23 + $0x38] sm:$0xff]  ;;  %s311_s25 = sshll.u32 %s153_s24, 4  ;;  %s297_s30 = scalar_lea.sflag [#allocation4], %s680_s16  ;;  %s724_s25 = int_to_ptr.vmem [resolvable:$true] %s311_s25 }
  0x2f   : > { %v188_v9 = vadd.f32 %v187_v4, %v157_v2  ;;  %v256_v11 = vadd.f32 %v225_v6, %v224_v5  ;;  %v229_v18 = vmul.f32 %v160_v12, %v160_v12  ;;  %v230_v22 = vmul.f32 %v161_v16, %v161_v16  ;;  %v163_v24 = vld [vmem:[%s684_s23 + $0x40] sm:$0xff]  ;;  %v164_v28 = vld [vmem:[%s684_s23 + $0x48] sm:$0xff]  ;;  %v165_v32 = vld [vmem:[%s684_s23 + $0x50] sm:$0xff]  ;;  %s500_s2 = scalar_lea.vmem %s724_s25, 32  ;;  %s585_s9 = smov [#allocation5]  }
  0x30   : > { %v231_v26 = vmul.f32 %v162_v20, %v162_v20  ;;  %v232_v30 = vmul.f32 %v163_v24, %v163_v24  ;;  %v233_v34 = vmul.f32 %v164_v28, %v164_v28  ;;  %v166_v36 = vld [vmem:[%s684_s23 + $0x58] sm:$0xff]  ;;  %v234_v38 = vmul.f32 %v165_v32, %v165_v32  ;;  %v167_v40 = vld [vmem:[%s684_s23 + $0x60] sm:$0xff]  ;;  %v168_v44 = vld [vmem:[%s684_s23 + $0x68] sm:$0xff]  ;;  %p501_p8 = scmp.ne.s32.totalorder %s724_s25, %s500_s2  ;;  %s504_s3 = sshll.u32 %s585_s9, 4  ;;  %s505_s3 = int_to_ptr.vmem [resolvable:$false] %s504_s3 }
  0x31   : > { %v189_v13 = vadd.f32 %v188_v9, %v158_v3  ;;  %v257_v15 = vadd.f32 %v256_v11, %v226_v7  ;;  %v235_v42 = vmul.f32 %v166_v36, %v166_v36  ;;  %v236_v46 = vmul.f32 %v167_v40, %v167_v40  ;;  %v169_v48 = vld [vmem:[%s684_s23 + $0x70] sm:$0xff]  ;;  %v170_v52 = vld [vmem:[%s684_s23 + $0x78] sm:$0xff]  ;;  %v171_v56 = vld [vmem:[%s684_s23 + $0x80] sm:$0xff]  ;;  %s506_s4 = scalar_lea.vmem %s505_s3, 64  ;;  %p507_p1 = scmp.lt.s32.totalorder %s724_s25, %s505_s3 }
  0x32   : > { %v237_v50 = vmul.f32 %v168_v44, %v168_v44  ;;  %v238_v54 = vmul.f32 %v169_v48, %v169_v48  ;;  %v239_v58 = vmul.f32 %v170_v52, %v170_v52  ;;  %v172_v60 = vld [vmem:[%s684_s23 + $0x88] sm:$0xff]  ;;  %v240_v62 = vmul.f32 %v171_v56, %v171_v56  ;;  %v173_v0 = vld [vmem:[%s684_s23 + $0x90] sm:$0xff]  ;;  %v174_v4 = vld [vmem:[%s684_s23 + $0x98] sm:$0xff]  ;;  %p502_p12 = pnand %p501_p8, %p647_p9  ;;  %p508_p3 = scmp.lt.s32.totalorder %s506_s4, %s500_s2 }
  0x33   : > { %v190_v17 = vadd.f32 %v189_v13, %v159_v8  ;;  %v258_v19 = vadd.f32 %v257_v15, %v227_v10  ;;  %v241_v2 = vmul.f32 %v172_v60, %v172_v60  ;;  %v242_v6 = vmul.f32 %v173_v0, %v173_v0  ;;  %v175_v8 = vld [vmem:[%s684_s23 + $0xa0] sm:$0xff] }
  0x34   : > { %v243_v10 = vmul.f32 %v174_v4, %v174_v4  ;;  %p503_p0 = pneg %p502_p12  ;;  %p509_p5 = por %p508_p3, %p507_p1 }
  0x35   : > { %v191_v21 = vadd.f32 %v190_v17, %v160_v12  ;;  %v259_v23 = vadd.f32 %v258_v19, %v228_v14  ;;  %v176_v12 = vld [vmem:[%s684_s23 + $0xa8] sm:$0xff]  ;;  %v244_v14 = vmul.f32 %v175_v8, %v175_v8 }
  0x36   : > { %p510_p6 = pnand %p509_p5, %p503_p0 }
  0x37   : > { %v192_v25 = vadd.f32 %v191_v21, %v161_v16  ;;  %v260_v27 = vadd.f32 %v259_v23, %v229_v18  ;;  %v177_v16 = vld [vmem:[%s684_s23 + $0xb0] sm:$0xff]  ;;  %v245_v18 = vmul.f32 %v176_v12, %v176_v12 }
  0x39   : > { %v193_v29 = vadd.f32 %v192_v25, %v162_v20  ;;  %v261_v31 = vadd.f32 %v260_v27, %v230_v22  ;;  %v178_v20 = vld [vmem:[%s684_s23 + $0xb8] sm:$0xff]  ;;  %v246_v22 = vmul.f32 %v177_v16, %v177_v16 }
  0x3b   : > { %v194_v33 = vadd.f32 %v193_v29, %v163_v24  ;;  %v262_v35 = vadd.f32 %v261_v31, %v231_v26  ;;  %v179_v24 = vld [vmem:[%s684_s23 + $0xc0] sm:$0xff]  ;;  %v247_v26 = vmul.f32 %v178_v20, %v178_v20 }
  0x3d   : > { %v195_v37 = vadd.f32 %v194_v33, %v164_v28  ;;  %v263_v39 = vadd.f32 %v262_v35, %v232_v30  ;;  %v180_v28 = vld [vmem:[%s684_s23 + $0xc8] sm:$0xff]  ;;  %v248_v30 = vmul.f32 %v179_v24, %v179_v24 }
  0x3f   : > { %v196_v41 = vadd.f32 %v195_v37, %v165_v32  ;;  %v264_v43 = vadd.f32 %v263_v39, %v233_v34  ;;  %v181_v32 = vld [vmem:[%s684_s23 + $0xd0] sm:$0xff]  ;;  %v249_v34 = vmul.f32 %v180_v28, %v180_v28 }
  0x41   : > { %v197_v45 = vadd.f32 %v196_v41, %v166_v36  ;;  %v265_v47 = vadd.f32 %v264_v43, %v234_v38  ;;  %v182_v36 = vld [vmem:[%s684_s23 + $0xd8] sm:$0xff]  ;;  %v250_v38 = vmul.f32 %v181_v32, %v181_v32 }
  0x43   : > { %v198_v49 = vadd.f32 %v197_v45, %v167_v40  ;;  %v266_v51 = vadd.f32 %v265_v47, %v235_v42  ;;  %v183_v40 = vld [vmem:[%s684_s23 + $0xe0] sm:$0xff]  ;;  %v251_v42 = vmul.f32 %v182_v36, %v182_v36 }
  0x45   : > { %v199_v53 = vadd.f32 %v198_v49, %v168_v44  ;;  %v267_v55 = vadd.f32 %v266_v51, %v236_v46  ;;  %v184_v44 = vld [vmem:[%s684_s23 + $0xe8] sm:$0xff]  ;;  %v252_v46 = vmul.f32 %v183_v40, %v183_v40 }
  0x47   : > { %v200_v57 = vadd.f32 %v199_v53, %v169_v48  ;;  %v268_v59 = vadd.f32 %v267_v55, %v237_v50  ;;  %v185_v48 = vld [vmem:[%s684_s23 + $0xf0] sm:$0xff]  ;;  %v253_v50 = vmul.f32 %v184_v44, %v184_v44 }
  0x49   : > { %v201_v61 = vadd.f32 %v200_v57, %v170_v52  ;;  %v269_v63 = vadd.f32 %v268_v59, %v238_v54  ;;  %v186_v52 = vld [vmem:[%s684_s23 + $0xf8] sm:$0xff]  ;;  %v254_v54 = vmul.f32 %v185_v48, %v185_v48 }
  0x4a   : > { %v255_v57 = vmul.f32 %v186_v52, %v186_v52 }
  0x4b   : > { %v202_v1 = vadd.f32 %v201_v61, %v171_v56  ;;  %v270_v3 = vadd.f32 %v269_v63, %v239_v58 }
  0x4d   : > { %v203_v5 = vadd.f32 %v202_v1, %v172_v60  ;;  %v271_v7 = vadd.f32 %v270_v3, %v240_v62 }
  0x4f   : > { %v204_v9 = vadd.f32 %v203_v5, %v173_v0  ;;  %v272_v11 = vadd.f32 %v271_v7, %v241_v2 }
  0x51   : > { %v205_v13 = vadd.f32 %v204_v9, %v174_v4  ;;  %v273_v15 = vadd.f32 %v272_v11, %v242_v6 }
  0x53   : > { %v206_v17 = vadd.f32 %v205_v13, %v175_v8  ;;  %v274_v19 = vadd.f32 %v273_v15, %v243_v10 }
  0x55   : > { %v207_v21 = vadd.f32 %v206_v17, %v176_v12  ;;  %v275_v23 = vadd.f32 %v274_v19, %v244_v14 }
  0x57   : > { %v208_v25 = vadd.f32 %v207_v21, %v177_v16  ;;  %v276_v27 = vadd.f32 %v275_v23, %v245_v18 }
  0x59   : > { %v209_v29 = vadd.f32 %v208_v25, %v178_v20  ;;  %v277_v31 = vadd.f32 %v276_v27, %v246_v22 }
  0x5b   : > { %v210_v33 = vadd.f32 %v209_v29, %v179_v24  ;;  %v278_v35 = vadd.f32 %v277_v31, %v247_v26 }
  0x5d   : > { %v211_v37 = vadd.f32 %v210_v33, %v180_v28  ;;  %v279_v39 = vadd.f32 %v278_v35, %v248_v30 }
  0x5f   : > { %v212_v41 = vadd.f32 %v211_v37, %v181_v32  ;;  %v280_v43 = vadd.f32 %v279_v39, %v249_v34 }
  0x61   : > { %v213_v45 = vadd.f32 %v212_v41, %v182_v36  ;;  %v281_v47 = vadd.f32 %v280_v43, %v250_v38 }
  0x63   : > { %v214_v49 = vadd.f32 %v213_v45, %v183_v40  ;;  %v282_v51 = vadd.f32 %v281_v47, %v251_v42 }
  0x65   : > { %v215_v53 = vadd.f32 %v214_v49, %v184_v44  ;;  %v283_v55 = vadd.f32 %v282_v51, %v252_v46 }
  0x67   : > { %v216_v56 = vadd.f32 %v215_v53, %v185_v48  ;;  %v284_v58 = vadd.f32 %v283_v55, %v253_v50 }
  0x69   : > { %v217_v59 = vadd.f32 %v216_v56, %v186_v52  ;;  %v285_v60 = vadd.f32 %v284_v58, %v254_v54 }
  0x6b   : > { %v218_v61 = vrot.slane %v217_v59, 4  ;;  %v286_v62 = vadd.f32 %v285_v60, %v255_v57 }
  0x6d   : > { %v219_v63 = vadd.f32 %v218_v61, %v217_v59  ;;  %v287_v0 = vrot.slane %v286_v62, 4 }
  0x6f   : > { %v220_v1 = vrot.slane %v219_v63, 2  ;;  %v288_v2 = vadd.f32 %v287_v0, %v286_v62 }
  0x71   : > { %v221_v3 = vadd.f32 %v220_v1, %v219_v63  ;;  %v289_v4 = vrot.slane %v288_v2, 2 }
  0x73   : > { %v222_v5 = vrot.slane %v221_v3, 1  ;;  %v290_v6 = vadd.f32 %v289_v4, %v288_v2 }
  0x75   : > { %v223_v7 = vadd.f32 %v222_v5, %v221_v3  ;;  %v291_v8 = vrot.slane %v290_v6, 1 }
  0x77   : > { %v292_v9 = vadd.f32 %v291_v8, %v290_v6 }
  0x79   : > { %v294_v10 = vsel %vm293_vm0, %v223_v7, %v292_v9 }
  0x7a   : > { %295 = vst [vmem:[%s153_s24] sm:$0x3] %v294_v10 }
  0x7b   : > { %513 = shalt.err (!%p510_p6)
}
  0x7c   : > { %s514_s5 = scalar_lea.hbm %s309_s29, 32  ;;  %s518_s15 = scalar_lea.hbm %s770_s1, 64 }
  0x7d   : > { %p515_p7 = scmp.ne.s32.totalorder %s309_s29, %s514_s5  ;;  %p519_p13 = scmp.lt.s32.totalorder %s309_s29, %s770_s1 }
  0x7e   : > { %p520_p2 = scmp.lt.s32.totalorder %s518_s15, %s514_s5 }
  0x7f   : > { %p516_p10 = pnand %p515_p7, %p647_p9 }
  0x80   : > { %p521_p8 = por %p520_p2, %p519_p13 }
  0x81   : > { %p517_p4 = pneg %p516_p10 }
  0x83   : > { %p522_p12 = pnand %p521_p8, %p517_p4 }
  0x85   : > { %525 = shalt.err (!%p522_p12)
}
  0x86   : > { %410 = dma.vmem_to_hbm [thread:$0]  (%p647_p9), %s724_s25, 32, %s309_s29, %s297_s30  }
  0x87 PF: > { %s323_s22 = sand.u32 1, %s560_s6   ;;  %p776_p0 = scmp.ge.s32.totalorder %s580_s11, 2 }
  0x88   : > { %s324_s23 = scalar_lea.sflag [#allocation4], %s323_s22 }
  0x89   : > { %p417_p1 = pnand %p776_p0, %p654_p11 }
  0x8b   : > { %p418_p3 = pneg %p417_p1 }
  0x8d   : > { %555 = dma.done.wait (%p418_p3), %s324_s23, 32  }
  0x8e   : > { %557 = vsyncadd (%p418_p3), %s324_s23, 4294967264  ;;  %s17_s11 = sadd.s32 1, %s580_s11   ;;  %s777_s6 = smov %s564_s7 }
  0x8f   : > { %p14_p5 = scmp.ge.s32.totalorder %s17_s11, 4   ;;  %s778_s7 = smov %s568_s8 }
  0x90   : > { %s779_s8 = smov %s652_s20  ;;  %s780_s9 = smov %s576_s10 }
  0x91   : > { %s781_s10 = smov %s783_s14  ;;  %16 = sbr.rel (!%p14_p5) target bundleno = 6 (0x6), region = 69 }
  0x96   :  { %329 = vsyncpa [#allocation3], 1 }
  0x97   :  { %331 = vsyncpa [#allocation3 + $0x1], 1 }
  0x98   :  { %332 = vsyncpa [#allocation4], 1 }
  0x99   :  { %334 = vsyncpa [#allocation4 + $0x1], 1 }

</bundles_post_ra>
